<compile_context>
chip_gen: v6e
topology: v6e:2x2x1
jax: 0.10.0
libtpu: 0.0.40
codegen_flags: <defaults>
</compile_context>

<pallas_src>
import numpy as np
import jax
import jax.numpy as jnp
from jax.experimental import pallas as pl
from jax.experimental.pallas import tpu as pltpu

try:  # prefer scipy's C implementation of the Hungarian algorithm if present
    from scipy.optimize import linear_sum_assignment as _scipy_lsa
except Exception:  # pragma: no cover
    _scipy_lsa = None


def _cdiv(a, b):
    return (a + b - 1) // b


# ----------------------------------------------------------------------------
# Pallas kernel: per-image (row-tile x col-tile) matching-cost block
# ----------------------------------------------------------------------------
def _make_cost_kernel(nf, w_class, w_bbox, w_giou, col_tile, gather_first,
                      box_compute_dtype=jnp.float32):
    alpha = 0.25
    eps = 1e-7
    # fold classification weight into the focal coefficients (exact)
    pos_coef = alpha * w_class
    neg_coef = (1.0 - alpha) * w_class
    # fold bbox weight into the squared distance (exact; sign handled separately)
    wb2 = w_bbox * w_bbox
    bbox_sign = 1.0 if w_bbox >= 0.0 else -1.0
    # fold giou weight / frame average / per-frame "-1" into a single scale + constant
    giou_scale = w_giou / float(nf)

    def kernel(sizes_ref, logits_ref, onehot_ref, ob_ref, tbT_ref, c_ref):
        # sizes_ref  : (bs,) int32 in SMEM (scalar prefetch) — #targets of each image
        # logits_ref : (1, TN, C_pad)  bf16 class logits (query tile)
        # onehot_ref : (1, C_pad, COL) bf16 one-hot target labels (column tile)
        # ob_ref     : (1, TN, D)      bf16 predicted boxes, frame-major cxcywh, D = 4*nf
        # tbT_ref    : (1, D, COL)     bf16 target boxes, transposed
        b = pl.program_id(0)
        j = pl.program_id(1)
        active = (j * col_tile) < sizes_ref[b]

        @pl.when(active)
        def _compute():
            onehot = onehot_ref[0]                       # (C_pad, COL) bf16
            ob_bf = ob_ref[0]                            # (TN, D) bf16
            tbT_bf = tbT_ref[0]                          # (D, COL) bf16
            ob32 = ob_bf.astype(jnp.float32)
            tbT32 = tbT_bf.astype(jnp.float32)

            # ---- focal classification cost (gathered via one-hot matmul on the MXU) ----
            if gather_first:
                # gather logits first (C_pad > COL): focal is elementwise so it commutes
                glog = jnp.dot(logits_ref[0], onehot,
                               preferred_element_type=jnp.float32)      # (TN, COL)
                prob = jax.nn.sigmoid(glog)
                one_m = 1.0 - prob
                cost_class = (pos_coef * (one_m * one_m) * (-jnp.log(prob + 1e-8))
                              - neg_coef * (prob * prob) * (-jnp.log(one_m + 1e-8)))
            else:
                logits = logits_ref[0].astype(jnp.float32)              # (TN, C_pad)
                prob = jax.nn.sigmoid(logits)
                one_m = 1.0 - prob
                pn = (pos_coef * (one_m * one_m) * (-jnp.log(prob + 1e-8))
                      - neg_coef * (prob * prob) * (-jnp.log(one_m + 1e-8)))
                cost_class = jnp.dot(pn.astype(jnp.bfloat16), onehot,
                                     preferred_element_type=jnp.float32)  # (TN, COL)

            # ---- w_bbox * cdist(p=2):  sqrt(wb2*(||o||^2 + ||t||^2 - 2 o.t)) ----
            cross = jnp.dot(ob_bf, tbT_bf, preferred_element_type=jnp.float32)  # (TN, COL)
            o_sq = jnp.sum(ob32 * ob32, axis=1, keepdims=True)                  # (TN, 1)
            t_sq = jnp.sum(tbT32 * tbT32, axis=0, keepdims=True)                # (1, COL)
            d2 = (wb2 * o_sq + wb2 * t_sq) - (2.0 * wb2) * cross
            cost_bbox = bbox_sign * jnp.sqrt(jnp.maximum(d2, 0.0))

            # ---- GIoU term with constants folded:
            #   w_giou * (1/nf) * sum_f(-giou_f) = w_giou - giou_scale * sum_f(iou + union/area_e)
            if box_compute_dtype == jnp.float32:
                obx, tbx = ob32, tbT32
            else:  # packed bf16 VALU math (v6e / v7x); accumulator stays f32
                obx, tbx = ob_bf.astype(box_compute_dtype), tbT_bf.astype(box_compute_dtype)

            acc = jnp.zeros_like(cross)                 # f32 accumulator
            for f in range(nf):
                ocx = obx[:, 4 * f + 0:4 * f + 1]
                ocy = obx[:, 4 * f + 1:4 * f + 2]
                ow = obx[:, 4 * f + 2:4 * f + 3]
                oh = obx[:, 4 * f + 3:4 * f + 4]
                ox0, oy0 = ocx - 0.5 * ow, ocy - 0.5 * oh
                ox1, oy1 = ocx + 0.5 * ow, ocy + 0.5 * oh

                tcx = tbx[4 * f + 0:4 * f + 1, :]
                tcy = tbx[4 * f + 1:4 * f + 2, :]
                tw = tbx[4 * f + 2:4 * f + 3, :]
                th = tbx[4 * f + 3:4 * f + 4, :]
                tx0, ty0 = tcx - 0.5 * tw, tcy - 0.5 * th
                tx1, ty1 = tcx + 0.5 * tw, tcy + 0.5 * th

                area_o = ow * oh                         # (TN, 1)
                area_t = tw * th                         # (1, COL)

                iw = jnp.maximum(jnp.minimum(ox1, tx1) - jnp.maximum(ox0, tx0), 0.0)
                ih = jnp.maximum(jnp.minimum(oy1, ty1) - jnp.maximum(oy0, ty0), 0.0)
                inter = iw * ih
                union = (area_o + area_t) - inter
                area_e = ((jnp.maximum(ox1, tx1) - jnp.minimum(ox0, tx0))
                          * (jnp.maximum(oy1, ty1) - jnp.minimum(oy0, ty0)))

                inter32 = inter.astype(jnp.float32)
                union32 = union.astype(jnp.float32)
                ae32 = area_e.astype(jnp.float32)
                # eps clamps guard against degenerate (zero-area) boxes -> no inf/NaN in C
                acc = acc + (inter32 * pl.reciprocal(jnp.maximum(union32, eps), approx=True)
                             + union32 * pl.reciprocal(jnp.maximum(ae32, eps), approx=True))

            c_ref[0] = (cost_bbox + cost_class
                        + (w_giou - giou_scale * acc)).astype(c_ref.dtype)

        @pl.when(jnp.logical_not(active))
        def _padding():
            # column tile entirely past this image's targets: cheap constant store
            c_ref[...] = jnp.zeros(c_ref.shape, c_ref.dtype)

    return kernel


# ----------------------------------------------------------------------------
# Wrapper: build padded, per-image inputs and launch the Pallas kernel
# ----------------------------------------------------------------------------
def compute_cost_matrix(pred_logits, pred_boxes, targets, nf,
                        w_class, w_bbox, w_giou,
                        max_row_tile=256, max_col_tile=256,
                        box_compute_dtype=jnp.float32):
    """Per-image matching-cost blocks.

    Returns (C, sizes): C is a jnp array (bs, nq_pad, T_pad) float32 where
    C[i, :nq, :sizes[i]] is image i's (query x target) cost block; None if no targets.
    """
    bs, nq, num_classes = pred_logits.shape
    nf = int(nf)
    D = 4 * nf
    sizes = [int(v["labels"].shape[0]) for v in targets]
    if sum(sizes) == 0:
        # Zero-width cost blocks cannot (and need not) be lowered.
        return None, sizes

    # --- target (column) tiling: 128-aligned tiles; padded tiles skipped in-kernel ---
    max_s = max(sizes)
    col_tile = min(max_col_tile, 128 * _cdiv(max_s, 128))
    n_col_tiles = _cdiv(max_s, col_tile)
    T_pad = n_col_tiles * col_tile

    # --- classes padded to a 128 multiple (lane-aligned focal pass / MXU K dim) ---
    C_pad = 128 * _cdiv(num_classes, 128)

    labels_p, boxes_p = [], []
    for v, s in zip(targets, sizes):
        lab = jnp.asarray(v["labels"], jnp.int32).reshape(-1)
        box = jnp.asarray(v["boxes"], jnp.float32).reshape(s, D) if s > 0 \
            else jnp.zeros((0, D), jnp.float32)
        labels_p.append(jnp.pad(lab, (0, T_pad - s)))
        # pad with benign non-degenerate boxes (padded lanes are also skipped/ignored)
        boxes_p.append(jnp.pad(box, ((0, T_pad - s), (0, 0)), constant_values=0.25))
    labels_p = jnp.stack(labels_p)                                       # (bs, T_pad)
    boxes_p = jnp.stack(boxes_p)                                         # (bs, T_pad, D)
    onehot = jnp.transpose(jax.nn.one_hot(labels_p, C_pad, dtype=jnp.bfloat16),
                           (0, 2, 1))                                    # (bs, C_pad, T_pad)
    tbT = jnp.transpose(boxes_p, (0, 2, 1)).astype(jnp.bfloat16)         # (bs, D, T_pad)

    # --- query (row) tiling: nq_pad ~= nq; >=2 parallel grid steps for dual-TC chips ---
    n_row_tiles = _cdiv(nq, max_row_tile)
    if bs * n_col_tiles * n_row_tiles < 2 and nq >= 16:
        n_row_tiles = 2
    if n_row_tiles == 1:
        tile_n = 8 * _cdiv(nq, 8)
    else:
        tile_n = 16 * _cdiv(nq, 16 * n_row_tiles)   # bf16-friendly sublane granularity
    nq_pad = n_row_tiles * tile_n

    logits = jnp.asarray(pred_logits, jnp.float32)                       # (bs, nq, C)
    ob = jnp.transpose(jnp.asarray(pred_boxes, jnp.float32),
                       (0, 2, 1, 3)).reshape(bs, nq, D)                  # (bs, nq, D)
    pad_rows = nq_pad - nq
    pad_cls = C_pad - num_classes
    if pad_rows or pad_cls:
        logits = jnp.pad(logits, ((0, 0), (0, pad_rows), (0, pad_cls)))
    if pad_rows:
        ob = jnp.pad(ob, ((0, 0), (0, pad_rows), (0, 0)), constant_values=0.25)
    logits = logits.astype(jnp.bfloat16)
    ob = ob.astype(jnp.bfloat16)

    gather_first = C_pad > col_tile
    sizes_arr = jnp.asarray(sizes, jnp.int32)

    kernel = _make_cost_kernel(nf, float(w_class), float(w_bbox), float(w_giou),
                               col_tile, gather_first, box_compute_dtype)

    C = pl.pallas_call(
        kernel,
        out_shape=jax.ShapeDtypeStruct((bs, nq_pad, T_pad), jnp.float32),
        grid_spec=pltpu.PrefetchScalarGridSpec(
            num_scalar_prefetch=1,
            grid=(bs, n_col_tiles, n_row_tiles),   # row axis innermost: onehot/tbT not re-DMAed
            in_specs=[
                pl.BlockSpec((1, tile_n, C_pad), lambda b, j, i, sz: (b, i, 0)),   # logits
                pl.BlockSpec((1, C_pad, col_tile), lambda b, j, i, sz: (b, 0, j)),  # onehot
                pl.BlockSpec((1, tile_n, D), lambda b, j, i, sz: (b, i, 0)),        # pred boxes
                pl.BlockSpec((1, D, col_tile), lambda b, j, i, sz: (b, 0, j)),      # tgt boxes^T
            ],
            out_specs=pl.BlockSpec((1, tile_n, col_tile), lambda b, j, i, sz: (b, i, j)),
        ),
        compiler_params=pltpu.CompilerParams(
            dimension_semantics=("parallel", "parallel", "parallel")),
    )(sizes_arr, logits, onehot, ob, tbT)
    # no device-side slice: the padded buffer is returned and sliced on the host
    return C, sizes


# ----------------------------------------------------------------------------
# Host-side Hungarian assignment (inherently sequential — no Pallas equivalent)
# ----------------------------------------------------------------------------
def _lsa_numpy(cost):
    """Augmenting-path (Jonker-Volgenant style) assignment; inner loop vectorized."""
    cost = np.asarray(cost, dtype=np.float64)
    if cost.shape[0] == 0 or cost.shape[1] == 0:
        return np.zeros(0, np.int64), np.zeros(0, np.int64)
    transposed = cost.shape[0] > cost.shape[1]
    a = cost.T if transposed else cost
    n, m = a.shape  # n <= m
    u = np.zeros(n + 1)
    v = np.zeros(m + 1)
    p = np.zeros(m + 1, dtype=np.int64)     # col -> assigned row (1-based), 0 = free
    way = np.zeros(m + 1, dtype=np.int64)
    for i in range(1, n + 1):
        p[0] = i
        j0 = 0
        minv = np.full(m + 1, np.inf)
        used = np.zeros(m + 1, dtype=bool)
        while True:
            used[j0] = True
            i0 = p[j0]
            jf = np.nonzero(~used[1:])[0] + 1                   # free columns (vectorized)
            cur = a[i0 - 1, jf - 1] - u[i0] - v[jf]
            upd = cur < minv[jf]
            minv[jf] = np.where(upd, cur, minv[jf])
            way[jf] = np.where(upd, j0, way[jf])
            k = int(np.argmin(minv[jf]))
            j1 = int(jf[k])
            delta = minv[j1]
            u[p[used]] += delta                                  # rows in p[used] are distinct
            v[used] -= delta
            minv[~used] -= delta
            j0 = j1
            if p[j0] == 0:
                break
        while j0 != 0:
            j1 = int(way[j0])
            p[j0] = p[j1]
            j0 = j1
    rows, cols = [], []
    for j in range(1, m + 1):
        if p[j] > 0:
            rows.append(p[j] - 1)
            cols.append(j - 1)
    rows = np.asarray(rows, np.int64)
    cols = np.asarray(cols, np.int64)
    if transposed:
        rows, cols = cols, rows
    order = np.argsort(rows, kind="stable")
    return rows[order], cols[order]


def _linear_sum_assignment(cost):
    # TODO(synk): Hungarian assignment is inherently sequential; it runs on the host
    # (scipy's C implementation when available, otherwise vectorized numpy).
    if _scipy_lsa is not None:
        r, c = _scipy_lsa(np.asarray(cost, dtype=np.float64))
        return np.asarray(r, np.int64), np.asarray(c, np.int64)
    return _lsa_numpy(cost)


# ----------------------------------------------------------------------------
# HungarianMatcher module (JAX/Pallas)
# ----------------------------------------------------------------------------
class HungarianMatcher:
    def __init__(self, multi_frame, cost_class=1.0, cost_bbox=1.0,
                 cost_giou=1.0, cost_mask=1.0):
        self.multi_frame = multi_frame
        self.cost_class = cost_class
        self.cost_bbox = cost_bbox
        self.cost_giou = cost_giou
        self.cost_mask = cost_mask
        assert cost_class != 0 or cost_bbox != 0 or cost_giou != 0 or cost_mask != 0, \
            "all costs cant be 0"

    def forward(self, outputs, targets, nf, valid_ratios):
        pred_logits = outputs["pred_logits"]           # (bs, nq, num_classes)
        pred_boxes = outputs["pred_boxes"]             # (bs, nf, nq, 4)
        nq = pred_logits.shape[1]

        C_dev, sizes = compute_cost_matrix(
            pred_logits, pred_boxes, targets, nf,
            self.cost_class, self.cost_bbox, self.cost_giou)
        if C_dev is None:
            return [(np.zeros(0, np.int64), np.zeros(0, np.int64)) for _ in targets]

        jax.block_until_ready(C_dev)
        C = np.asarray(jax.device_get(C_dev))          # (bs, nq_pad, T_pad); slice on host

        indices = []
        for i, s in enumerate(sizes):
            if s == 0:
                indices.append((np.zeros(0, np.int64), np.zeros(0, np.int64)))
                continue
            r, c = _linear_sum_assignment(C[i, :nq, :s])
            indices.append((np.asarray(r, np.int64), np.asarray(c, np.int64)))
        return indices

    __call__ = forward


# ----------------------------------------------------------------------------
# Pure-JAX per-image reference (exact divides / direct cdist) for verification
# ----------------------------------------------------------------------------
def _cost_ref_image(logits_i, ob_i, labels_i, boxes_i, nf, w_class, w_bbox, w_giou):
    # logits_i (nq, C), ob_i (nq, 4*nf), labels_i (s,), boxes_i (s, 4*nf)
    prob = jax.nn.sigmoid(logits_i)
    alpha = 0.25
    neg = (1 - alpha) * prob**2 * (-jnp.log(1 - prob + 1e-8))
    pos = alpha * (1 - prob)**2 * (-jnp.log(prob + 1e-8))
    cost_class = (pos - neg)[:, labels_i]
    diff = ob_i[:, None, :] - boxes_i[None, :, :]
    cost_bbox = jnp.sqrt(jnp.sum(diff * diff, axis=-1))
    ob3 = ob_i.reshape(-1, nf, 4)
    tb3 = boxes_i.reshape(-1, nf, 4)
    cost_giou = 0.0
    for f in range(nf):
        o = ob3[:, f]
        t = tb3[:, f]
        o_xy = jnp.concatenate([o[:, :2] - 0.5 * o[:, 2:], o[:, :2] + 0.5 * o[:, 2:]], -1)
        t_xy = jnp.concatenate([t[:, :2] - 0.5 * t[:, 2:], t[:, :2] + 0.5 * t[:, 2:]], -1)
        ao = (o_xy[:, 2] - o_xy[:, 0]) * (o_xy[:, 3] - o_xy[:, 1])
        at = (t_xy[:, 2] - t_xy[:, 0]) * (t_xy[:, 3] - t_xy[:, 1])
        lt = jnp.maximum(o_xy[:, None, :2], t_xy[None, :, :2])
        rb = jnp.minimum(o_xy[:, None, 2:], t_xy[None, :, 2:])
        wh = jnp.clip(rb - lt, 0)
        inter = wh[..., 0] * wh[..., 1]
        union = ao[:, None] + at[None, :] - inter
        iou = inter / union
        elt = jnp.minimum(o_xy[:, None, :2], t_xy[None, :, :2])
        erb = jnp.maximum(o_xy[:, None, 2:], t_xy[None, :, 2:])
        ewh = erb - elt
        ea = ewh[..., 0] * ewh[..., 1]
        cost_giou = cost_giou + -(iou - (ea - union) / ea)
    cost_giou = cost_giou / nf
    return w_bbox * cost_bbox + w_class * cost_class + w_giou * cost_giou


def _q(x):
    # match the bf16 quantization the kernel inputs see
    return jnp.asarray(x, jnp.float32).astype(jnp.bfloat16).astype(jnp.float32)


# ----------------------------------------------------------------------------
if __name__ == "__main__":
    key = jax.random.PRNGKey(0)
    bs, nq, num_classes, nf = 2, 8, 4, 2
    sizes = [3, 2]

    k1, k2, k3, k4, _ = jax.random.split(key, 5)
    pred_logits = jax.random.normal(k1, (bs, nq, num_classes), jnp.float32)
    cxcy = jax.random.uniform(k2, (bs, nf, nq, 2), minval=0.2, maxval=0.8)
    wh = jax.random.uniform(k3, (bs, nf, nq, 2), minval=0.1, maxval=0.3)
    pred_boxes = jnp.concatenate([cxcy, wh], axis=-1).astype(jnp.float32)

    targets = []
    tkeys = jax.random.split(k4, 3 * len(sizes))
    for i, s in enumerate(sizes):
        labels = jax.random.randint(tkeys[3 * i], (s,), 0, num_classes, dtype=jnp.int32)
        tcxcy = jax.random.uniform(tkeys[3 * i + 1], (s * nf, 2), minval=0.2, maxval=0.8)
        twh = jax.random.uniform(tkeys[3 * i + 2], (s * nf, 2), minval=0.1, maxval=0.3)
        targets.append({"labels": labels,
                        "boxes": jnp.concatenate([tcxcy, twh], axis=-1).astype(jnp.float32)})

    matcher = HungarianMatcher(multi_frame=True, cost_class=2.0, cost_bbox=5.0, cost_giou=2.0)
    outputs = {"pred_logits": pred_logits, "pred_boxes": pred_boxes}

    indices = matcher.forward(outputs, targets, nf, valid_ratios=None)

    # verify the Pallas cost blocks against a pure-JAX reference.  The reference consumes the
    # same bf16-quantized inputs as the kernel; tolerance covers the EUP approx reciprocals and
    # the bf16 MXU feeds (ranking-tolerant; only used for the Hungarian assignment).
    C_dev, got_sizes = compute_cost_matrix(pred_logits, pred_boxes, targets, nf,
                                           2.0, 5.0, 2.0)
    jax.block_until_ready(C_dev)
    C_np = np.asarray(jax.device_get(C_dev))
    ob_all = jnp.transpose(pred_boxes, (0, 2, 1, 3)).reshape(bs, nq, nf * 4)
    for i, s in enumerate(sizes):
        ref_i = _cost_ref_image(_q(pred_logits[i]), _q(ob_all[i]),
                                targets[i]["labels"],
                                _q(targets[i]["boxes"]).reshape(s, nf * 4),
                                nf, 2.0, 5.0, 2.0)
        assert np.allclose(C_np[i, :nq, :s], np.asarray(ref_i), rtol=3e-2, atol=3e-2), \
            f"cost block mismatch for image {i}"

    # basic shape sanity on the returned assignments
    for (r, c), s in zip(indices, sizes):
        assert r.dtype == np.int64 and c.dtype == np.int64
        assert len(r) == len(c) == min(nq, s)
        assert len(np.unique(r)) == len(r) and len(np.unique(c)) == len(c)

    print("KERNEL_OK")
</pallas_src>

<mosaic_0001>
module attributes {stable_mosaic.version = 11 : i64} {
  func.func @kernel(%arg0: i32, %arg1: i32, %arg2: i32, %arg3: memref<2xi32, #tpu.memory_space<smem>>, %arg4: memref<1x8x128xbf16, #tpu.memory_space<vmem>>, %arg5: memref<1x128x128xbf16, #tpu.memory_space<vmem>>, %arg6: memref<1x8x8xbf16, #tpu.memory_space<vmem>>, %arg7: memref<1x8x128xbf16, #tpu.memory_space<vmem>>, %arg8: memref<1x8x128xf32, #tpu.memory_space<vmem>>) attributes {dimension_semantics = [#tpu.dimension_semantics<parallel>, #tpu.dimension_semantics<parallel>, #tpu.dimension_semantics<parallel>], iteration_bounds = array<i64: 2, 1, 1>, scalar_prefetch = 1 : i64, scratch_operands = 0 : i64, tpu.core_type = #tpu.core_type<tc>, window_params = [{transform_indices = @transform_0, window_bounds = array<i64: 1, 8, 128>}, {transform_indices = @transform_1, window_bounds = array<i64: 1, 128, 128>}, {transform_indices = @transform_2, window_bounds = array<i64: 1, 8, 8>}, {transform_indices = @transform_3, window_bounds = array<i64: 1, 8, 128>}, {transform_indices = @transform_4, window_bounds = array<i64: 1, 8, 128>}]} {
    %c128_i32 = arith.constant 128 : i32
    %0 = arith.muli %arg1, %c128_i32 : i32
    %1 = arith.index_cast %arg0 : i32 to index
    %2 = memref.load %arg3[%1] : memref<2xi32, #tpu.memory_space<smem>>
    %3 = arith.cmpi slt, %0, %2 : i32
    %4 = arith.extui %3 : i1 to i32
    %c0_i32 = arith.constant 0 : i32
    %5 = arith.cmpi ne, %4, %c0_i32 : i32
    scf.if %5 {
      %c0 = arith.constant 0 : index
      %c0_1 = arith.constant 0 : index
      %c0_2 = arith.constant 0 : index
      %9 = vector.load %arg5[%c0, %c0_1, %c0_2] : memref<1x128x128xbf16, #tpu.memory_space<vmem>>, vector<1x128x128xbf16>
      %10 = vector.shape_cast %9 : vector<1x128x128xbf16> to vector<128x128xbf16>
      %c0_3 = arith.constant 0 : index
      %c0_4 = arith.constant 0 : index
      %c0_5 = arith.constant 0 : index
      %11 = vector.load %arg6[%c0_3, %c0_4, %c0_5] : memref<1x8x8xbf16, #tpu.memory_space<vmem>>, vector<1x8x8xbf16>
      %12 = vector.shape_cast %11 : vector<1x8x8xbf16> to vector<8x8xbf16>
      %c0_6 = arith.constant 0 : index
      %c0_7 = arith.constant 0 : index
      %c0_8 = arith.constant 0 : index
      %13 = vector.load %arg7[%c0_6, %c0_7, %c0_8] : memref<1x8x128xbf16, #tpu.memory_space<vmem>>, vector<1x8x128xbf16>
      %14 = vector.shape_cast %13 : vector<1x8x128xbf16> to vector<8x128xbf16>
      %15 = arith.extf %12 : vector<8x8xbf16> to vector<8x8xf32>
      %16 = arith.extf %14 : vector<8x128xbf16> to vector<8x128xf32>
      %c0_9 = arith.constant 0 : index
      %c0_10 = arith.constant 0 : index
      %c0_11 = arith.constant 0 : index
      %17 = vector.load %arg4[%c0_9, %c0_10, %c0_11] : memref<1x8x128xbf16, #tpu.memory_space<vmem>>, vector<1x8x128xbf16>
      %18 = vector.shape_cast %17 : vector<1x8x128xbf16> to vector<8x128xbf16>
      %19 = arith.extf %18 : vector<8x128xbf16> to vector<8x128xf32>
      %20 = arith.negf %19 : vector<8x128xf32>
      %21 = math.exp %20 : vector<8x128xf32>
      %cst = arith.constant 1.000000e+00 : f32
      %22 = vector.broadcast %cst : f32 to vector<8x128xf32>
      %23 = arith.addf %22, %21 : vector<8x128xf32>
      %24 = arith.divf %22, %23 : vector<8x128xf32>
      %cst_12 = arith.constant 1.000000e+00 : f32
      %25 = vector.broadcast %cst_12 : f32 to vector<8x128xf32>
      %26 = arith.subf %25, %24 : vector<8x128xf32>
      %27 = arith.mulf %26, %26 : vector<8x128xf32>
      %cst_13 = arith.constant 5.000000e-01 : f32
      %28 = vector.broadcast %cst_13 : f32 to vector<8x128xf32>
      %29 = arith.mulf %28, %27 : vector<8x128xf32>
      %cst_14 = arith.constant 9.99999993E-9 : f32
      %30 = vector.broadcast %cst_14 : f32 to vector<8x128xf32>
      %31 = arith.addf %24, %30 : vector<8x128xf32>
      %32 = math.log %31 : vector<8x128xf32>
      %cst_15 = arith.constant 0.000000e+00 : f32
      %33 = vector.broadcast %cst_15 : f32 to vector<8x128xf32>
      %34 = arith.subf %33, %32 : vector<8x128xf32>
      %35 = arith.mulf %29, %34 : vector<8x128xf32>
      %36 = arith.mulf %24, %24 : vector<8x128xf32>
      %cst_16 = arith.constant 1.500000e+00 : f32
      %37 = vector.broadcast %cst_16 : f32 to vector<8x128xf32>
      %38 = arith.mulf %37, %36 : vector<8x128xf32>
      %cst_17 = arith.constant 9.99999993E-9 : f32
      %39 = vector.broadcast %cst_17 : f32 to vector<8x128xf32>
      %40 = arith.addf %26, %39 : vector<8x128xf32>
      %41 = math.log %40 : vector<8x128xf32>
      %cst_18 = arith.constant 0.000000e+00 : f32
      %42 = vector.broadcast %cst_18 : f32 to vector<8x128xf32>
      %43 = arith.subf %42, %41 : vector<8x128xf32>
      %44 = arith.mulf %38, %43 : vector<8x128xf32>
      %45 = arith.subf %35, %44 : vector<8x128xf32>
      %46 = arith.truncf %45 : vector<8x128xf32> to vector<8x128xbf16>
      %cst_19 = arith.constant dense<0.000000e+00> : vector<8x128xf32>
      %47 = tpu.matmul %46, %10, %cst_19 {dimension_numbers = #tpu.dot_dimension_numbers<[1], [0], [0], [1], [0, 0, 1, 1], [], []>} : vector<8x128xbf16>, vector<128x128xbf16>, vector<8x128xf32> -> vector<8x128xf32>
      %cst_20 = arith.constant dense<0.000000e+00> : vector<8x128xf32>
      %48 = tpu.matmul %12, %14, %cst_20 {dimension_numbers = #tpu.dot_dimension_numbers<[1], [0], [0], [1], [0, 0, 1, 1], [], []>} : vector<8x8xbf16>, vector<8x128xbf16>, vector<8x128xf32> -> vector<8x128xf32>
      %49 = arith.mulf %15, %15 : vector<8x8xf32>
      %cst_21 = arith.constant dense<0.000000e+00> : vector<8xf32>
      %50 = vector.multi_reduction <add>, %49, %cst_21 [1] : vector<8x8xf32> to vector<8xf32>
      %51 = vector.shape_cast %50 : vector<8xf32> to vector<8x1xf32>
      %52 = arith.mulf %16, %16 : vector<8x128xf32>
      %cst_22 = arith.constant dense<0.000000e+00> : vector<128xf32>
      %53 = vector.multi_reduction <add>, %52, %cst_22 [0] : vector<8x128xf32> to vector<128xf32>
      %54 = vector.shape_cast %53 : vector<128xf32> to vector<1x128xf32>
      %cst_23 = arith.constant 2.500000e+01 : f32
      %55 = vector.broadcast %cst_23 : f32 to vector<8x1xf32>
      %56 = arith.mulf %55, %51 : vector<8x1xf32>
      %cst_24 = arith.constant 2.500000e+01 : f32
      %57 = vector.broadcast %cst_24 : f32 to vector<1x128xf32>
      %58 = arith.mulf %57, %54 : vector<1x128xf32>
      %59 = vector.broadcast %56 : vector<8x1xf32> to vector<8x128xf32>
      %60 = vector.broadcast %58 : vector<1x128xf32> to vector<8x128xf32>
      %61 = arith.addf %59, %60 : vector<8x128xf32>
      %cst_25 = arith.constant 5.000000e+01 : f32
      %62 = vector.broadcast %cst_25 : f32 to vector<8x128xf32>
      %63 = arith.mulf %62, %48 : vector<8x128xf32>
      %64 = arith.subf %61, %63 : vector<8x128xf32>
      %cst_26 = arith.constant 0.000000e+00 : f32
      %65 = vector.broadcast %cst_26 : f32 to vector<8x128xf32>
      %66 = arith.maximumf %64, %65 : vector<8x128xf32>
      %67 = math.sqrt %66 : vector<8x128xf32>
      %cst_27 = arith.constant 1.000000e+00 : f32
      %68 = vector.broadcast %cst_27 : f32 to vector<8x128xf32>
      %69 = arith.mulf %68, %67 : vector<8x128xf32>
      %cst_28 = arith.constant 0.000000e+00 : f32
      %70 = vector.broadcast %cst_28 : f32 to vector<8x128xf32>
      %71 = vector.extract_strided_slice %15 {offsets = [0, 0], sizes = [8, 1], strides = [1, 1]} : vector<8x8xf32> to vector<8x1xf32>
      %72 = vector.extract_strided_slice %15 {offsets = [0, 1], sizes = [8, 1], strides = [1, 1]} : vector<8x8xf32> to vector<8x1xf32>
      %73 = vector.extract_strided_slice %15 {offsets = [0, 2], sizes = [8, 1], strides = [1, 1]} : vector<8x8xf32> to vector<8x1xf32>
      %74 = vector.extract_strided_slice %15 {offsets = [0, 3], sizes = [8, 1], strides = [1, 1]} : vector<8x8xf32> to vector<8x1xf32>
      %cst_29 = arith.constant 5.000000e-01 : f32
      %75 = vector.broadcast %cst_29 : f32 to vector<8x1xf32>
      %76 = arith.mulf %75, %73 : vector<8x1xf32>
      %77 = arith.subf %71, %76 : vector<8x1xf32>
      %cst_30 = arith.constant 5.000000e-01 : f32
      %78 = vector.broadcast %cst_30 : f32 to vector<8x1xf32>
      %79 = arith.mulf %78, %74 : vector<8x1xf32>
      %80 = arith.subf %72, %79 : vector<8x1xf32>
      %cst_31 = arith.constant 5.000000e-01 : f32
      %81 = vector.broadcast %cst_31 : f32 to vector<8x1xf32>
      %82 = arith.mulf %81, %73 : vector<8x1xf32>
      %83 = arith.addf %71, %82 : vector<8x1xf32>
      %cst_32 = arith.constant 5.000000e-01 : f32
      %84 = vector.broadcast %cst_32 : f32 to vector<8x1xf32>
      %85 = arith.mulf %84, %74 : vector<8x1xf32>
      %86 = arith.addf %72, %85 : vector<8x1xf32>
      %87 = vector.extract_strided_slice %16 {offsets = [0, 0], sizes = [1, 128], strides = [1, 1]} : vector<8x128xf32> to vector<1x128xf32>
      %88 = vector.extract_strided_slice %16 {offsets = [1, 0], sizes = [1, 128], strides = [1, 1]} : vector<8x128xf32> to vector<1x128xf32>
      %89 = vector.extract_strided_slice %16 {offsets = [2, 0], sizes = [1, 128], strides = [1, 1]} : vector<8x128xf32> to vector<1x128xf32>
      %90 = vector.extract_strided_slice %16 {offsets = [3, 0], sizes = [1, 128], strides = [1, 1]} : vector<8x128xf32> to vector<1x128xf32>
      %cst_33 = arith.constant 5.000000e-01 : f32
      %91 = vector.broadcast %cst_33 : f32 to vector<1x128xf32>
      %92 = arith.mulf %91, %89 : vector<1x128xf32>
      %93 = arith.subf %87, %92 : vector<1x128xf32>
      %cst_34 = arith.constant 5.000000e-01 : f32
      %94 = vector.broadcast %cst_34 : f32 to vector<1x128xf32>
      %95 = arith.mulf %94, %90 : vector<1x128xf32>
      %96 = arith.subf %88, %95 : vector<1x128xf32>
      %cst_35 = arith.constant 5.000000e-01 : f32
      %97 = vector.broadcast %cst_35 : f32 to vector<1x128xf32>
      %98 = arith.mulf %97, %89 : vector<1x128xf32>
      %99 = arith.addf %87, %98 : vector<1x128xf32>
      %cst_36 = arith.constant 5.000000e-01 : f32
      %100 = vector.broadcast %cst_36 : f32 to vector<1x128xf32>
      %101 = arith.mulf %100, %90 : vector<1x128xf32>
      %102 = arith.addf %88, %101 : vector<1x128xf32>
      %103 = arith.mulf %73, %74 : vector<8x1xf32>
      %104 = arith.mulf %89, %90 : vector<1x128xf32>
      %105 = vector.broadcast %83 : vector<8x1xf32> to vector<8x128xf32>
      %106 = vector.broadcast %99 : vector<1x128xf32> to vector<8x128xf32>
      %107 = arith.minimumf %105, %106 : vector<8x128xf32>
      %108 = vector.broadcast %77 : vector<8x1xf32> to vector<8x128xf32>
      %109 = vector.broadcast %93 : vector<1x128xf32> to vector<8x128xf32>
      %110 = arith.maximumf %108, %109 : vector<8x128xf32>
      %111 = arith.subf %107, %110 : vector<8x128xf32>
      %cst_37 = arith.constant 0.000000e+00 : f32
      %112 = vector.broadcast %cst_37 : f32 to vector<8x128xf32>
      %113 = arith.maximumf %111, %112 : vector<8x128xf32>
      %114 = vector.broadcast %86 : vector<8x1xf32> to vector<8x128xf32>
      %115 = vector.broadcast %102 : vector<1x128xf32> to vector<8x128xf32>
      %116 = arith.minimumf %114, %115 : vector<8x128xf32>
      %117 = vector.broadcast %80 : vector<8x1xf32> to vector<8x128xf32>
      %118 = vector.broadcast %96 : vector<1x128xf32> to vector<8x128xf32>
      %119 = arith.maximumf %117, %118 : vector<8x128xf32>
      %120 = arith.subf %116, %119 : vector<8x128xf32>
      %cst_38 = arith.constant 0.000000e+00 : f32
      %121 = vector.broadcast %cst_38 : f32 to vector<8x128xf32>
      %122 = arith.maximumf %120, %121 : vector<8x128xf32>
      %123 = arith.mulf %113, %122 : vector<8x128xf32>
      %124 = vector.broadcast %103 : vector<8x1xf32> to vector<8x128xf32>
      %125 = vector.broadcast %104 : vector<1x128xf32> to vector<8x128xf32>
      %126 = arith.addf %124, %125 : vector<8x128xf32>
      %127 = arith.subf %126, %123 : vector<8x128xf32>
      %128 = vector.broadcast %83 : vector<8x1xf32> to vector<8x128xf32>
      %129 = vector.broadcast %99 : vector<1x128xf32> to vector<8x128xf32>
      %130 = arith.maximumf %128, %129 : vector<8x128xf32>
      %131 = vector.broadcast %77 : vector<8x1xf32> to vector<8x128xf32>
      %132 = vector.broadcast %93 : vector<1x128xf32> to vector<8x128xf32>
      %133 = arith.minimumf %131, %132 : vector<8x128xf32>
      %134 = arith.subf %130, %133 : vector<8x128xf32>
      %135 = vector.broadcast %86 : vector<8x1xf32> to vector<8x128xf32>
      %136 = vector.broadcast %102 : vector<1x128xf32> to vector<8x128xf32>
      %137 = arith.maximumf %135, %136 : vector<8x128xf32>
      %138 = vector.broadcast %80 : vector<8x1xf32> to vector<8x128xf32>
      %139 = vector.broadcast %96 : vector<1x128xf32> to vector<8x128xf32>
      %140 = arith.minimumf %138, %139 : vector<8x128xf32>
      %141 = arith.subf %137, %140 : vector<8x128xf32>
      %142 = arith.mulf %134, %141 : vector<8x128xf32>
      %cst_39 = arith.constant 1.000000e-07 : f32
      %143 = vector.broadcast %cst_39 : f32 to vector<8x128xf32>
      %144 = arith.maximumf %127, %143 : vector<8x128xf32>
      %145 = tpu.reciprocal %144 {approx = true} : vector<8x128xf32> -> vector<8x128xf32>
      %146 = arith.mulf %123, %145 : vector<8x128xf32>
      %cst_40 = arith.constant 1.000000e-07 : f32
      %147 = vector.broadcast %cst_40 : f32 to vector<8x128xf32>
      %148 = arith.maximumf %142, %147 : vector<8x128xf32>
      %149 = tpu.reciprocal %148 {approx = true} : vector<8x128xf32> -> vector<8x128xf32>
      %150 = arith.mulf %127, %149 : vector<8x128xf32>
      %151 = arith.addf %146, %150 : vector<8x128xf32>
      %152 = arith.addf %70, %151 : vector<8x128xf32>
      %153 = vector.extract_strided_slice %15 {offsets = [0, 4], sizes = [8, 1], strides = [1, 1]} : vector<8x8xf32> to vector<8x1xf32>
      %154 = vector.extract_strided_slice %15 {offsets = [0, 5], sizes = [8, 1], strides = [1, 1]} : vector<8x8xf32> to vector<8x1xf32>
      %155 = vector.extract_strided_slice %15 {offsets = [0, 6], sizes = [8, 1], strides = [1, 1]} : vector<8x8xf32> to vector<8x1xf32>
      %156 = vector.extract_strided_slice %15 {offsets = [0, 7], sizes = [8, 1], strides = [1, 1]} : vector<8x8xf32> to vector<8x1xf32>
      %cst_41 = arith.constant 5.000000e-01 : f32
      %157 = vector.broadcast %cst_41 : f32 to vector<8x1xf32>
      %158 = arith.mulf %157, %155 : vector<8x1xf32>
      %159 = arith.subf %153, %158 : vector<8x1xf32>
      %cst_42 = arith.constant 5.000000e-01 : f32
      %160 = vector.broadcast %cst_42 : f32 to vector<8x1xf32>
      %161 = arith.mulf %160, %156 : vector<8x1xf32>
      %162 = arith.subf %154, %161 : vector<8x1xf32>
      %cst_43 = arith.constant 5.000000e-01 : f32
      %163 = vector.broadcast %cst_43 : f32 to vector<8x1xf32>
      %164 = arith.mulf %163, %155 : vector<8x1xf32>
      %165 = arith.addf %153, %164 : vector<8x1xf32>
      %cst_44 = arith.constant 5.000000e-01 : f32
      %166 = vector.broadcast %cst_44 : f32 to vector<8x1xf32>
      %167 = arith.mulf %166, %156 : vector<8x1xf32>
      %168 = arith.addf %154, %167 : vector<8x1xf32>
      %169 = vector.extract_strided_slice %16 {offsets = [4, 0], sizes = [1, 128], strides = [1, 1]} : vector<8x128xf32> to vector<1x128xf32>
      %170 = vector.extract_strided_slice %16 {offsets = [5, 0], sizes = [1, 128], strides = [1, 1]} : vector<8x128xf32> to vector<1x128xf32>
      %171 = vector.extract_strided_slice %16 {offsets = [6, 0], sizes = [1, 128], strides = [1, 1]} : vector<8x128xf32> to vector<1x128xf32>
      %172 = vector.extract_strided_slice %16 {offsets = [7, 0], sizes = [1, 128], strides = [1, 1]} : vector<8x128xf32> to vector<1x128xf32>
      %cst_45 = arith.constant 5.000000e-01 : f32
      %173 = vector.broadcast %cst_45 : f32 to vector<1x128xf32>
      %174 = arith.mulf %173, %171 : vector<1x128xf32>
      %175 = arith.subf %169, %174 : vector<1x128xf32>
      %cst_46 = arith.constant 5.000000e-01 : f32
      %176 = vector.broadcast %cst_46 : f32 to vector<1x128xf32>
      %177 = arith.mulf %176, %172 : vector<1x128xf32>
      %178 = arith.subf %170, %177 : vector<1x128xf32>
      %cst_47 = arith.constant 5.000000e-01 : f32
      %179 = vector.broadcast %cst_47 : f32 to vector<1x128xf32>
      %180 = arith.mulf %179, %171 : vector<1x128xf32>
      %181 = arith.addf %169, %180 : vector<1x128xf32>
      %cst_48 = arith.constant 5.000000e-01 : f32
      %182 = vector.broadcast %cst_48 : f32 to vector<1x128xf32>
      %183 = arith.mulf %182, %172 : vector<1x128xf32>
      %184 = arith.addf %170, %183 : vector<1x128xf32>
      %185 = arith.mulf %155, %156 : vector<8x1xf32>
      %186 = arith.mulf %171, %172 : vector<1x128xf32>
      %187 = vector.broadcast %165 : vector<8x1xf32> to vector<8x128xf32>
      %188 = vector.broadcast %181 : vector<1x128xf32> to vector<8x128xf32>
      %189 = arith.minimumf %187, %188 : vector<8x128xf32>
      %190 = vector.broadcast %159 : vector<8x1xf32> to vector<8x128xf32>
      %191 = vector.broadcast %175 : vector<1x128xf32> to vector<8x128xf32>
      %192 = arith.maximumf %190, %191 : vector<8x128xf32>
      %193 = arith.subf %189, %192 : vector<8x128xf32>
      %cst_49 = arith.constant 0.000000e+00 : f32
      %194 = vector.broadcast %cst_49 : f32 to vector<8x128xf32>
      %195 = arith.maximumf %193, %194 : vector<8x128xf32>
      %196 = vector.broadcast %168 : vector<8x1xf32> to vector<8x128xf32>
      %197 = vector.broadcast %184 : vector<1x128xf32> to vector<8x128xf32>
      %198 = arith.minimumf %196, %197 : vector<8x128xf32>
      %199 = vector.broadcast %162 : vector<8x1xf32> to vector<8x128xf32>
      %200 = vector.broadcast %178 : vector<1x128xf32> to vector<8x128xf32>
      %201 = arith.maximumf %199, %200 : vector<8x128xf32>
      %202 = arith.subf %198, %201 : vector<8x128xf32>
      %cst_50 = arith.constant 0.000000e+00 : f32
      %203 = vector.broadcast %cst_50 : f32 to vector<8x128xf32>
      %204 = arith.maximumf %202, %203 : vector<8x128xf32>
      %205 = arith.mulf %195, %204 : vector<8x128xf32>
      %206 = vector.broadcast %185 : vector<8x1xf32> to vector<8x128xf32>
      %207 = vector.broadcast %186 : vector<1x128xf32> to vector<8x128xf32>
      %208 = arith.addf %206, %207 : vector<8x128xf32>
      %209 = arith.subf %208, %205 : vector<8x128xf32>
      %210 = vector.broadcast %165 : vector<8x1xf32> to vector<8x128xf32>
      %211 = vector.broadcast %181 : vector<1x128xf32> to vector<8x128xf32>
      %212 = arith.maximumf %210, %211 : vector<8x128xf32>
      %213 = vector.broadcast %159 : vector<8x1xf32> to vector<8x128xf32>
      %214 = vector.broadcast %175 : vector<1x128xf32> to vector<8x128xf32>
      %215 = arith.minimumf %213, %214 : vector<8x128xf32>
      %216 = arith.subf %212, %215 : vector<8x128xf32>
      %217 = vector.broadcast %168 : vector<8x1xf32> to vector<8x128xf32>
      %218 = vector.broadcast %184 : vector<1x128xf32> to vector<8x128xf32>
      %219 = arith.maximumf %217, %218 : vector<8x128xf32>
      %220 = vector.broadcast %162 : vector<8x1xf32> to vector<8x128xf32>
      %221 = vector.broadcast %178 : vector<1x128xf32> to vector<8x128xf32>
      %222 = arith.minimumf %220, %221 : vector<8x128xf32>
      %223 = arith.subf %219, %222 : vector<8x128xf32>
      %224 = arith.mulf %216, %223 : vector<8x128xf32>
      %cst_51 = arith.constant 1.000000e-07 : f32
      %225 = vector.broadcast %cst_51 : f32 to vector<8x128xf32>
      %226 = arith.maximumf %209, %225 : vector<8x128xf32>
      %227 = tpu.reciprocal %226 {approx = true} : vector<8x128xf32> -> vector<8x128xf32>
      %228 = arith.mulf %205, %227 : vector<8x128xf32>
      %cst_52 = arith.constant 1.000000e-07 : f32
      %229 = vector.broadcast %cst_52 : f32 to vector<8x128xf32>
      %230 = arith.maximumf %224, %229 : vector<8x128xf32>
      %231 = tpu.reciprocal %230 {approx = true} : vector<8x128xf32> -> vector<8x128xf32>
      %232 = arith.mulf %209, %231 : vector<8x128xf32>
      %233 = arith.addf %228, %232 : vector<8x128xf32>
      %234 = arith.addf %152, %233 : vector<8x128xf32>
      %235 = arith.addf %69, %47 : vector<8x128xf32>
      %cst_53 = arith.constant 1.000000e+00 : f32
      %236 = vector.broadcast %cst_53 : f32 to vector<8x128xf32>
      %237 = arith.mulf %236, %234 : vector<8x128xf32>
      %cst_54 = arith.constant 2.000000e+00 : f32
      %238 = vector.broadcast %cst_54 : f32 to vector<8x128xf32>
      %239 = arith.subf %238, %237 : vector<8x128xf32>
      %240 = arith.addf %235, %239 : vector<8x128xf32>
      %c0_55 = arith.constant 0 : index
      %c0_56 = arith.constant 0 : index
      %c0_57 = arith.constant 0 : index
      %241 = vector.load %arg8[%c0_55, %c0_56, %c0_57] : memref<1x8x128xf32, #tpu.memory_space<vmem>>, vector<1x8x128xf32>
      %242 = vector.shape_cast %241 : vector<1x8x128xf32> to vector<8x128xf32>
      %243 = vector.shape_cast %240 : vector<8x128xf32> to vector<1x8x128xf32>
      tpu.vector_store %arg8[%c0_55, %c0_56, %c0_57], %243 {strides = array<i32>} : memref<1x8x128xf32, #tpu.memory_space<vmem>>, vector<1x8x128xf32>,
    } else {
    }
    %true = arith.constant true
    %6 = arith.xori %3, %true : i1
    %7 = arith.extui %6 : i1 to i32
    %c0_i32_0 = arith.constant 0 : i32
    %8 = arith.cmpi ne, %7, %c0_i32_0 : i32
    scf.if %8 {
      %cst = arith.constant 0.000000e+00 : f32
      %9 = vector.broadcast %cst : f32 to vector<1x8x128xf32>
      %c0 = arith.constant 0 : index
      %c0_1 = arith.constant 0 : index
      %c0_2 = arith.constant 0 : index
      %10 = vector.load %arg8[%c0, %c0_1, %c0_2] : memref<1x8x128xf32, #tpu.memory_space<vmem>>, vector<1x8x128xf32>
      tpu.vector_store %arg8[%c0, %c0_1, %c0_2], %9 {strides = array<i32>} : memref<1x8x128xf32, #tpu.memory_space<vmem>>, vector<1x8x128xf32>,
    } else {
    }
    return
  }
  func.func @transform_0(%arg0: i32, %arg1: i32, %arg2: i32, %arg3: memref<2xi32, #tpu.memory_space<smem>>) -> (i32, i32, i32) {
    %c0_i32 = arith.constant 0 : i32
    %c0_i32_0 = arith.constant 0 : i32
    return %arg0, %arg2, %c0_i32 : i32, i32, i32
  }
  func.func @transform_1(%arg0: i32, %arg1: i32, %arg2: i32, %arg3: memref<2xi32, #tpu.memory_space<smem>>) -> (i32, i32, i32) {
    %c0_i32 = arith.constant 0 : i32
    %c0_i32_0 = arith.constant 0 : i32
    return %arg0, %c0_i32, %arg1 : i32, i32, i32
  }
  func.func @transform_2(%arg0: i32, %arg1: i32, %arg2: i32, %arg3: memref<2xi32, #tpu.memory_space<smem>>) -> (i32, i32, i32) {
    %c0_i32 = arith.constant 0 : i32
    %c0_i32_0 = arith.constant 0 : i32
    return %arg0, %arg2, %c0_i32 : i32, i32, i32
  }
  func.func @transform_3(%arg0: i32, %arg1: i32, %arg2: i32, %arg3: memref<2xi32, #tpu.memory_space<smem>>) -> (i32, i32, i32) {
    %c0_i32 = arith.constant 0 : i32
    %c0_i32_0 = arith.constant 0 : i32
    return %arg0, %c0_i32, %arg1 : i32, i32, i32
  }
  func.func @transform_4(%arg0: i32, %arg1: i32, %arg2: i32, %arg3: memref<2xi32, #tpu.memory_space<smem>>) -> (i32, i32, i32) {
    %c0_i32 = arith.constant 0 : i32
    return %arg0, %arg2, %arg1 : i32, i32, i32
  }
}

</mosaic_0001>

<bundles_post_ra>
// kernel: tpu_custom_call.1
= control target key start
LH: loop header
LB: loop body
LE: loop exit
PB: predicated region body
PF: predicated region fallthrough
CT: control target
= control target key end

     0   :  { %s1327_s18 = smov [#allocation3]   ;;  %s1642_s0 = inlined_call_operand.hbm [shape: s32[2], index: 0, kind: input, shape index: {}]   ;;  %s1643_s1 = inlined_call_operand.hbm [shape: bf16[2,8,128], index: 1, kind: input, shape index: {}]   ;;  %s1644_s2 = inlined_call_operand.hbm [shape: bf16[2,128,128], index: 2, kind: input, shape index: {}]   ;;  %s1645_s3 = inlined_call_operand.hbm [shape: bf16[2,8,8], index: 3, kind: input, shape index: {}]   ;;  %s1646_s4 = inlined_call_operand.hbm [shape: bf16[2,8,128], index: 4, kind: input, shape index: {}]   ;;  %s1647_s5 = inlined_call_operand.hbm [shape: f32[2,8,128], index: 5, kind: output, shape index: {}]  }
   0x1   :  { %1650 = sst [smem:[#allocation21_spill]] %s1644_s2 }
   0x2   :  { %11 = dma.hbm_to_smem %s1642_s0, 16, %s1327_s18, [#allocation2] }
   0x3   :  { %1285 = dma.done.wait [#allocation2], 16 }
   0x4   :  { %1286 = vsyncadd [#allocation2], 4294967280 }
   0x5   :  { %13 = sfence }
   0x6   :  { %14 = vsyncpa [#allocation5], 0 }
   0x7   :  { %16 = vsyncpa [#allocation5 + $0x1], 0 }
   0x8   :  { %17 = vsyncpa [#allocation8], 0 }
   0x9   :  { %19 = vsyncpa [#allocation8 + $0x1], 0 }
   0xa   :  { %20 = vsyncpa [#allocation11], 0 }
   0xb   :  { %22 = vsyncpa [#allocation11 + $0x1], 0 }
   0xc   :  { %23 = vsyncpa [#allocation6], 0 }
   0xd   :  { %25 = vsyncpa [#allocation6 + $0x1], 0  ;;  %s1379_s21 = smov 0   ;;  %s1381_s22 = smov 0  }
   0xe   :  { %s1383_s23 = smov 0   ;;  %s1385_s24 = smov 0  }
   0xf   :  { %s1387_s0 = smov 0   ;;  %s1389_s25 = smov 0  }
  0x10 LB: > { %1651 = sst [smem:[#allocation18_spill]] %s1321_s0  ;;  %s1410_s26 = sadd.s32 4294967295, %s1325_s25   ;;  %s1325_s25 = sphi %s1389_s25, %s31_s25   ;;  %s1321_s0 = sphi %s1387_s0, %s1664_s0   ;;  %s1317_s24 = sphi %s1385_s24, %s1663_s24   ;;  %s1313_s23 = sphi %s1383_s23, %s1667_s23   ;;  %s1309_s22 = sphi %s1381_s22, %s1666_s22   ;;  %s1305_s21 = sphi %s1379_s21, %s1665_s21  }
  0x11   : > { %s913_s27 = sadd.s32 4294967294, %s1325_s25   ;;  %s50_s28 = sadd.s32 1, %s1321_s0 }
  0x12   : > { %s59_s29 = sadd.s32 1, %s1313_s23  ;;  %p52_p0 = scmp.ge.s32.totalorder %s50_s28, 2 }
  0x13   : > { %p66_p1 = scmp.ne.s32.totalorder %s1313_s23, %s1309_s22  ;;  %p67_p2 = scmp.eq.s32.totalorder %s1325_s25, 0 }
  0x14   : > { %p72_p3 = scmp.ne.s32.totalorder %s1309_s22, %s1305_s21  ;;  %s1669_s28 = smov (%p52_p0, %s50_s28), 0 }
  0x15   : > { %1652 = sst [smem:[#allocation19_spill]] %s1669_s28  ;;  %p1422_p4 = por %p67_p2, %p66_p1 }
  0x16   : > { %p73_p5 = scmp.eq.s32.totalorder %s1410_s26, 0  ;;  %s54_s6 = ssub.s32 %s1321_s0, %s1669_s28 }
  0x17   : > { %p184_p6 = scmp.eq.s32.totalorder %s1410_s26, 1  ;;  %p57_p7 = scmp.eq.s32.totalorder %s54_s6, 0 }
  0x18   : > { %p1430_p8 = por %p73_p5, %p72_p3  ;;  %p190_p10 = scmp.eq.s32.totalorder %s913_s27, 1 }
  0x19   : > { %p1434_p9 = por %p184_p6, %p66_p1  ;;  %p1014_p13 = scmp.lt.s32.totalorder %s1325_s25, 2 }
  0x1a   : > { %s1439_s9 = scalar_select %p57_p7, %s1313_s23, %s59_s29  }
  0x1b   : > { %p1441_p11 = por %p190_p10, %p72_p3  ;;  %s1448_s11 = sand.u32 1, %s1313_s23  }
  0x1c   : > { %1656 = sst [smem:[#allocation20_spill]] %s1439_s9  ;;  %s229_s12 = sand.u32 1, %s1325_s25  }
  0x1d   : > { %s918_s13 = sshll.u32 %s1448_s11, 6  ;;  %p1454_p0 = pnand %p1014_p13, %p1422_p4 }
  0x1e   : > { %s949_s15 = sshll.u32 %s1321_s0, 10  ;;  %s1659_s2 = sld [smem:[#allocation21_spill]] }
  0x1f   : > { %s233_s19 = scalar_lea.vmem [#allocation7], %s918_s13  ;;  %s1462_s27 = scalar_lea.sflag [#allocation8], %s229_s12 }
  0x20   : > { %s241_s20 = sshll.u32 %s233_s19, 4  ;;  %p1125_p1 = pneg %p1454_p0  ;;  %s242_s20 = int_to_ptr.vmem [resolvable:$true] %s241_s20 }
  0x21   : > { %s1136_s29 = scalar_lea.vmem %s242_s20, 1024  ;;  %s1328_s30 = smov [#allocation7]  }
  0x22   : > { %p1137_p2 = scmp.ne.s32.totalorder %s242_s20, %s1136_s29  ;;  %s1141_s6 = sshll.u32 %s1328_s30, 4  ;;  %s1142_s6 = int_to_ptr.vmem [resolvable:$false] %s1141_s6 }
  0x23   : > { %s1143_s28 = scalar_lea.vmem %s1142_s6, 2048  ;;  %p1144_p5 = scmp.lt.s32.totalorder %s242_s20, %s1142_s6 }
  0x24   : > { %s240_s18 = scalar_lea.hbm %s1659_s2, %s949_s15  ;;  %p1139_p3 = pnand %p1137_p2, %p1125_p1 }
  0x25   : > { %p1145_p6 = scmp.lt.s32.totalorder %s1143_s28, %s1136_s29 }
  0x26   : > { %p1140_p4 = pneg %p1139_p3 }
  0x27   : > { %p1146_p7 = por %p1145_p6, %p1144_p5 }
  0x29   : > { %p1147_p10 = pnand %p1146_p7, %p1140_p4 }
  0x2b   : > { %1150 = shalt.err (!%p1147_p10)
}
  0x2c   : > { %s1329_s13 = smov 64   ;;  %s1330_s12 = smov 4  }
  0x2d   : > { %1003 = dma.hbm_to_vmem [thread:$0]  (!%p1454_p0), %s240_s18, 1024, %s242_s20, %s1462_s27, %s1329_s13, %s1329_s13, %s1330_s12  }
  0x2e   : > { %p925_p13 = scmp.ge.s32.totalorder %s1325_s25, 1  ;;  %p287_p2 = scmp.lt.s32.totalorder %s1325_s25, 3 }
  0x2f   : > { %s1479_s28 = sshll.u32 %s1448_s11, 2  ;;  %s1482_s16 = sshll.u32 %s1321_s0, 6 }
  0x30   : > { %p1474_p3 = pnand %p925_p13, %p287_p2  ;;  %s220_s29 = scalar_lea.hbm %s1643_s1, %s1482_s16 }
  0x31   : > { %s214_s30 = scalar_lea.vmem [#allocation4], %s1479_s28  ;;  %s261_s13 = scalar_lea.hbm %s1645_s3, %s1482_s16 }
  0x32   : > { %s222_s6 = sshll.u32 %s214_s30, 4  ;;  %s211_s12 = scalar_lea.sflag [#allocation5], %s1448_s11  ;;  %s223_s6 = int_to_ptr.vmem [resolvable:$true] %s222_s6 }
  0x33   : > { %s1164_s2 = scalar_lea.vmem %s223_s6, 64  ;;  %s1331_s0 = smov [#allocation4]  }
  0x34   : > { %p1165_p4 = scmp.ne.s32.totalorder %s223_s6, %s1164_s2  ;;  %s1169_s9 = sshll.u32 %s1331_s0, 4  ;;  %s1170_s9 = int_to_ptr.vmem [resolvable:$false] %s1169_s9 }
  0x35   : > { %s1171_s17 = scalar_lea.vmem %s1170_s9, 128  ;;  %p1172_p7 = scmp.lt.s32.totalorder %s223_s6, %s1170_s9 }
  0x36   : > { %p1167_p5 = pnand %p1165_p4, %p1125_p1  ;;  %p1173_p10 = scmp.lt.s32.totalorder %s1171_s17, %s1164_s2 }
  0x38   : > { %p1168_p6 = pneg %p1167_p5  ;;  %p1174_p13 = por %p1173_p10, %p1172_p7 }
  0x3a   : > { %p1175_p2 = pnand %p1174_p13, %p1168_p6 }
  0x3c   : > { %1178 = shalt.err (!%p1175_p2)
}
  0x3d   : > { %1000 = dma.hbm_to_vmem [thread:$0]  (!%p1454_p0), %s220_s29, 64, %s223_s6, %s211_s12  }
  0x3e   : > { %s255_s19 = scalar_lea.vmem [#allocation9], %s1479_s28  ;;  %s1332_s0 = smov [#allocation9]  }
  0x3f   : > { %s263_s30 = sshll.u32 %s255_s19, 4  ;;  %s1197_s9 = sshll.u32 %s1332_s0, 4  ;;  %s264_s30 = int_to_ptr.vmem [resolvable:$true] %s263_s30  ;;  %s1198_s9 = int_to_ptr.vmem [resolvable:$false] %s1197_s9 }
  0x40   : > { %s1192_s18 = scalar_lea.vmem %s264_s30, 64  ;;  %s1199_s2 = scalar_lea.vmem %s1198_s9, 128 }
  0x41   : > { %p1193_p4 = scmp.ne.s32.totalorder %s264_s30, %s1192_s18  ;;  %p1200_p6 = scmp.lt.s32.totalorder %s264_s30, %s1198_s9 }
  0x42   : > { %p1201_p7 = scmp.lt.s32.totalorder %s1199_s2, %s1192_s18 }
  0x43   : > { %p1195_p5 = pnand %p1193_p4, %p1125_p1 }
  0x44   : > { %p1202_p10 = por %p1201_p7, %p1200_p6 }
  0x45   : > { %p1196_p12 = pneg %p1195_p5 }
  0x47   : > { %p1203_p13 = pnand %p1202_p10, %p1196_p12 }
  0x49   : > { %1206 = shalt.err (!%p1203_p13)
}
  0x4a   : > { %1006 = dma.hbm_to_vmem [thread:$0]  (!%p1454_p0), %s261_s13, 64, %s264_s30, %s1462_s27  }
  0x4b   : > { %s280_s17 = scalar_lea.hbm %s1646_s4, %s1482_s16  ;;  %s274_s19 = scalar_lea.vmem [#allocation10], %s1479_s28 }
  0x4c   : > { %s282_s18 = sshll.u32 %s274_s19, 4  ;;  %s271_s0 = scalar_lea.sflag [#allocation11], %s1448_s11  ;;  %s283_s18 = int_to_ptr.vmem [resolvable:$true] %s282_s18 }
  0x4d   : > { %s1220_s9 = scalar_lea.vmem %s283_s18, 64  ;;  %s1333_s2 = smov [#allocation10]  }
  0x4e   : > { %p1221_p12 = scmp.ne.s32.totalorder %s283_s18, %s1220_s9  ;;  %s1225_s29 = sshll.u32 %s1333_s2, 4  ;;  %s1226_s29 = int_to_ptr.vmem [resolvable:$false] %s1225_s29 }
  0x4f   : > { %s1227_s6 = scalar_lea.vmem %s1226_s29, 128  ;;  %p1228_p5 = scmp.lt.s32.totalorder %s283_s18, %s1226_s29 }
  0x50   : > { %p1223_p2 = pnand %p1221_p12, %p1125_p1  ;;  %p1229_p6 = scmp.lt.s32.totalorder %s1227_s6, %s1220_s9 }
  0x52   : > { %p1224_p4 = pneg %p1223_p2  ;;  %p1230_p7 = por %p1229_p6, %p1228_p5 }
  0x54   : > { %p1231_p10 = pnand %p1230_p7, %p1224_p4 }
  0x56   : > { %1234 = shalt.err (!%p1231_p10)
}
  0x57   : > { %1009 = dma.hbm_to_vmem [thread:$0]  (!%p1454_p0), %s280_s17, 64, %s283_s18, %s271_s0  }
  0x58   : > { %291 = sbr.rel (%p1474_p3) target bundleno = 447 (0x1bf), region = 36  ;;  %s1525_s11 = sand.u32 (!%p1474_p3), 1, %s1309_s22  }
  0x59   : > { %s1528_s27 = sshll.u32 (!%p1474_p3), %s1525_s11, 2  ;;  %s294_s28 = scalar_lea.sflag (!%p1474_p3), [#allocation5], %s1525_s11 }
  0x5a   : > { %s297_s16 = scalar_lea.vmem (!%p1474_p3), [#allocation4], %s1528_s27 }
  0x5d   : > { %1288 = dma.done.wait (%p1430_p8), %s294_s28, 64  }
  0x5e   : > { %1290 = vsyncadd (%p1430_p8), %s294_s28, 4294967232  ;;  %s302_s14 = sand.u32 1, %s1410_s26   ;;  %s927_s15 = sshll.u32 %s1525_s11, 6 }
  0x5f   : > { %s303_s13 = scalar_lea.sflag [#allocation8], %s302_s14  ;;  %s1538_s30 = scalar_lea.vmem [#allocation7], %s927_s15 }
  0x60   : > { %1292 = dma.done.wait (%p1430_p8), %s303_s13, 1088  }
  0x61   : > { %1294 = vsyncadd (%p1430_p8), %s303_s13, 4294966208  ;;  %s315_s20 = scalar_lea.vmem [#allocation9], %s1528_s27  ;;  %s321_s12 = scalar_lea.sflag [#allocation11], %s1525_s11 }
  0x62   : > { %s324_s17 = scalar_lea.vmem [#allocation10], %s1528_s27 }
  0x63   : > { %1296 = dma.done.wait (%p1430_p8), %s321_s12, 64  }
  0x64   : > { %1298 = vsyncadd (%p1430_p8), %s321_s12, 4294967232  ;;  %s930_s26 = sshll.u32 %s1525_s11, 3  ;;  %s1553_s19 = sld [smem:[#allocation3 + %s1317_s24]] }
  0x65   : > { %s1555_s18 = scalar_lea.vmem [#allocation12], %s930_s26 }
  0x6a   : > { %p932_p0 = scmp.le.s32.totalorder %s1553_s19, 0 }
  0x6b   : > { %s1336_s7 = smov (!%p932_p0), 126   ;;  %s1338_s0 = smov (!%p932_p0), 127  }
  0x6c   : > { %370 = sbr.rel (%p932_p0) target bundleno = 415 (0x19f), region = 56 }
  0x71   : > { %v387_v0 = vld [vmem:[%s315_s20] sm:$0xf]  ;;  %v1089_v1 = vld [vmem:[%s1538_s30 + $0x38] sm:$0xff]   ;;  %v1334_v3 = vmov 0.0   ;;  %v1561_v4 = vld [vmem:[%s324_s17] sm:$0xf] }
  0x72   : > { %v1559_v2 = vunpack.c.l.bf16 %v387_v0  ;;  %961 = vmatprep.subr.bf16.mxu0 %v1334_v3  ;;  %981 = vmatprep.subr.bf16.mxu1 %v1334_v3  ;;  %vm508_vm0 = vcmask 1043456   ;;  %vm1335_vm1 = vmmov 0   ;;  %v1090_v7 = vld [vmem:[%s1538_s30 + $0x30] sm:$0xff]   ;;  %vm504_vm2 = vcmask 64512   ;;  %v1091_v11 = vld [vmem:[%s1538_s30 + $0x28] sm:$0xff]   ;;  %v1092_v13 = vld [vmem:[%s1538_s30 + $0x20] sm:$0xff]  }
  0x73   : > { %962 = vmatpush3.bf16.msra.mxu0 %v1089_v1  ;;  %v510_v6 = vsel %vm508_vm0, %v1561_v4, 0  ;;  %983 = vmatprep.mubr.msk.bf16.mxu1 %vm1335_vm1, %v1334_v3  ;;  %v1337_v10 = vmov 0   ;;  %v391_v12 = vld [vmem:[%s297_s16] sm:$0xf]  ;;  %v1094_v17 = vld [vmem:[%s1538_s30 + $0x10] sm:$0xff]   ;;  %v1095_v18 = vld [vmem:[%s1538_s30 + $0x8] sm:$0xff]   ;;  %v390_v50 = vunpack.c.l.bf16 %v1561_v4 }
  0x74   : > { %v576_v5 = vmul.f32 0.5, %v1559_v2  ;;  %963 = vmatprep.subr.bf16.mxu0 %v1334_v3  ;;  %v552_v8 = vmul.f32 %v1559_v2, %v1559_v2  ;;  %982 = vmatpush3.bf16.msra.mxu1 %v510_v6  ;;  %v392_v14 = vunpack.c.l.bf16 %v391_v12  ;;  %v1093_v16 = vld [vmem:[%s1538_s30 + $0x18] sm:$0xff]   ;;  %v1096_v19 = vld [vmem:[%s1538_s30] sm:$0xff]   ;;  %v1339_v43 = vmov 1  }
  0x75   : > { %977 = vmatprep.mubr.msk.bf16.mxu0 %vm1335_vm1, %v1334_v3  ;;  %1078 = vset.pattern.permute.xlu1 %v1337_v10  ;;  %v1340_v44 = vmov 4   ;;  %v1341_v46 = vmov 5   ;;  %v1342_v48 = vmov 2   ;;  %v1343_v49 = vmov 6  }
  0x76   : > { %578 = vrot.lane.b32.xlu0 %v576_v5, %s1336_s7  ;;  %v553_v9 = vsel %vm504_vm2, %v552_v8, 0.0  ;;  %v933_v15 = vmul.f32 -1.442695, %v392_v14  ;;  %v556_v51 = vmul.f32 %v390_v50, %v390_v50  ;;  %v583_v4 = vmul.f32 0.5, %v390_v50 }
  0x77   : > { %964 = vmatpush3.bf16.msra.mxu0 %v1090_v7  ;;  %554 = vadd.xlane.f32.xlu1 %v553_v9  ;;  %v603_v5 = vlaneseq }
  0x78   : > { %984 = vmatmul.mubr.msk.bf16.vlgmr.msra.gmra.mxu1 %vm504_vm2, %v387_v0  ;;  %965 = vmatprep.subr.bf16.mxu0 %v1334_v3  ;;  %1097 = vpow2.f32 %v933_v15  ;;  %v557_v52 = vrot.slane %v556_v51, 4  ;;  %v585_v6 = vrot.slane %v583_v4, 2 }
  0x79   : > { %1079 = vset.pattern.permute.xlu0 %v1337_v10  ;;  %v1587_v7 = vshrl.u32 %v603_v5, 7 }
  0x7a   : > { %590 = vrot.lane.b32.xlu0 %v1559_v2, %s1338_s0  ;;  %v558_v53 = vadd.f32 %v557_v52, %v556_v51 }
  0x7b   : > { %966 = vmatpush3.bf16.msra.mxu0 %v1091_v11  ;;  %v626_v10 = vsub.s32 1, %v1587_v7  ;;  %v587_v11 = vsub.f32 %v390_v50, %v585_v6  ;;  %v605_v12 = vsub.s32 0, %v1587_v7 }
  0x7c   : > { %967 = vmatprep.subr.bf16.mxu0 %v1334_v3  ;;  %v559_v54 = vrot.slane %v558_v53, 2 }
  0x7e   : > { %v560_v55 = vadd.f32 %v559_v54, %v558_v53 }
  0x7f   : > { %968 = vmatpush3.bf16.msra.mxu0 %v1092_v13  ;;  %v588_v13 = vadd.f32 %v585_v6, %v390_v50 }
  0x80   : > { %969 = vmatprep.subr.bf16.mxu0 %v1334_v3  ;;  %v561_v56 = vrot.slane %v560_v55, 1 }
  0x81   : > { %v627_v14 = vrot.slane %v588_v13, %v626_v10 }
  0x82   : > { %v562_v57 = vadd.f32 %v561_v56, %v560_v55 }
  0x83   : > { %970 = vmatpush3.bf16.msra.mxu0 %v1093_v16  ;;  %v636_v16 = vrot.slane %v587_v11, %v626_v10 }
  0x84   : > { %971 = vmatprep.subr.bf16.mxu0 %v1334_v3  ;;  %v564_v59 = vmul.f32 25.0, %v562_v57 }
  0x85   : > { %v1098_v20 = vpop.eup %1097 }
  0x86   : > { %v396_v21 = vadd.f32 1.0, %v1098_v20  ;;  %v673_v20 = vsub.s32 4, %v1587_v7 }
  0x87   : > { %972 = vmatpush3.bf16.msra.mxu0 %v1094_v17 }
  0x88   : > { %973 = vmatprep.subr.bf16.mxu0 %v1334_v3  ;;  %1099 = vrcp.f32 %v396_v21  ;;  %v693_v21 = vsub.s32 5, %v1587_v7 }
  0x8b   : > { %974 = vmatpush3.bf16.msra.mxu0 %v1095_v18  ;;  %v616_v18 = vrot.slane %v587_v11, %v605_v12 }
  0x8c   : > { %975 = vmatprep.subr.bf16.mxu0 %v1334_v3 }
  0x8f   : > { %976 = vmatpush3.bf16.msra.mxu0 %v1096_v19  ;;  %v606_v19 = vrot.slane %v588_v13, %v605_v12 }
  0x95   : > { %v1100_v22 = vpop.eup %1099 }
  0x96   : > { %v399_v23 = vsub.f32 1.0, %v1100_v22  ;;  %v402_v24 = vadd.f32 1e-08, %v1100_v22  ;;  %v407_v27 = vmul.f32 %v1100_v22, %v1100_v22 }
  0x98   : > { %1101 = vlog2.f32 %v402_v24  ;;  %v409_v25 = vadd.f32 1e-08, %v399_v23  ;;  %v400_v26 = vmul.f32 %v399_v23, %v399_v23  ;;  %v408_v33 = vmul.f32 1.5, %v407_v27 }
  0x99   : > { %v595_v24 = vrot.slane %v390_v50, 1 }
  0x9a   : > { %1103 = vlog2.f32 %v409_v25  ;;  %v401_v29 = vmul.f32 0.5, %v400_v26 }
  0xa5   : > { %v1102_v28 = vpop.eup %1101 }
  0xa6   : > { %v404_v30 = vmul.f32 0.6931472, %v1102_v28 }
  0xa7   : > { %v1104_v31 = vpop.eup %1103 }
  0xa8   : > { %v405_v32 = vsub.f32 0.0, %v404_v30  ;;  %v411_v34 = vmul.f32 0.6931472, %v1104_v31  ;;  %v683_v30 = vrot.slane %v587_v11, %v673_v20  ;;  %v703_v31 = vrot.slane %v587_v11, %v693_v21 }
  0xaa   : > { %v406_v35 = vmul.f32 %v405_v32, %v401_v29  ;;  %v412_v36 = vsub.f32 0.0, %v411_v34  ;;  %v674_v29 = vrot.slane %v588_v13, %v673_v20  ;;  %v694_v32 = vrot.slane %v588_v13, %v693_v21 }
  0xac   : > { %v413_v37 = vmul.f32 %v412_v36, %v408_v33  ;;  %v648_v33 = vsub.s32 2, %v1587_v7 }
  0xae   : > { %v414_v38 = vsub.f32 %v406_v35, %v413_v37  ;;  %v597_v37 = vmul.f32 %v595_v24, %v390_v50  ;;  %v714_v50 = vsub.s32 6, %v1587_v7 }
  0xb0   : > { %v415_v39 = vpack.c.bf16 %v414_v38, %v414_v38  ;;  %v649_v54 = vrot.slane %v597_v37, %v648_v33 }
  0xb2   : > { %978 = vmatmul.mubr.bf16.vlgmr.msra.gmra.mxu0 %v415_v39 }
  0xe8   : > { %v579_v40 = vpop.permute.xlu0 %578 }
  0xe9   : > { %v581_v41 = vsub.f32 %v1559_v2, %v579_v40  ;;  %v582_v42 = vadd.f32 %v579_v40, %v1559_v2 }
  0xeb   : > { %610 = vperm.xlu0 %1079, %v581_v41   ;;  %600 = vperm.xlu1 %1078, %v582_v42  }
  0xec   : > { %v591_v45 = vpop.permute.xlu0 %590 }
  0xed   : > { %v593_v47 = vmul.f32 %v591_v45, %v1559_v2 }
  0xef   : > { %1080 = vset.pattern.permute.xlu0 %v1339_v43  ;;  %1081 = vset.pattern.permute.xlu1 %v1339_v43 }
  0xf0   : > { %621 = vperm.xlu0 %1080, %v582_v42   ;;  %630 = vperm.xlu1 %1081, %v581_v41  }
  0xf4   : > { %1082 = vset.pattern.permute.xlu0 %v1340_v44  ;;  %1083 = vset.pattern.permute.xlu1 %v1340_v44 }
  0xf5   : > { %668 = vperm.xlu0 %1082, %v582_v42   ;;  %677 = vperm.xlu1 %1083, %v581_v41  }
  0xf9   : > { %1085 = vset.pattern.permute.xlu0 %v1341_v46  ;;  %1084 = vset.pattern.permute.xlu1 %v1341_v46 }
  0xfa   : > { %697 = vperm.xlu0 %1085, %v581_v41   ;;  %688 = vperm.xlu1 %1084, %v582_v42  }
  0xfe   : > { %1086 = vset.pattern.permute.xlu1 %v1342_v48  ;;  %1088 = vset.pattern.permute.xlu0 %v1343_v49 }
  0xff   : > { %643 = vperm.xlu1 %1086, %v593_v47  }
 0x100   : > { %v555_v58 = vpop.xlane.xlu1 %554 }
 0x101   : > { %v563_v60 = vmul.f32 25.0, %v555_v58 }
 0x103   : > { %1087 = vset.pattern.permute.xlu1 %v1343_v49  ;;  %v1581_v61 = vadd.f32 %v564_v59, %v563_v60 }
 0x104   : > { %709 = vperm.xlu1 %1087, %v593_v47  }
 0x138   : > { %v546_v62 = vpop.f32.mrf.mxu1 }
 0x139   : > { %v1583_v63 = vmul.f32 50.0, %v546_v62 }
 0x13a   : > { %v985_v0 = vpop.f32.mrf.mxu1 }
 0x13b   : > { %v567_v1 = vsub.f32 %v1581_v61, %v1583_v63 }
 0x13c   : > { %v549_v2 = vpop.f32.mrf.mxu1 }
 0x13d   : > { %v568_v10 = vmax.f32 %v567_v1, 0.0 }
 0x13e   : > { %v986_v3 = vpop.f32.mrf.mxu1 }
 0x13f   : > { %1105 = vrsqrt.f32 %v568_v10  ;;  %vm571_vm3 = vcmp.eq.f32.partialorder %v568_v10, inf  ;;  %vm573_vm4 = vcmp.eq.f32.partialorder %v568_v10, 0.0 }
 0x166   : > { %v611_v8 = vpop.permute.xlu0 %610  ;;  %v601_v9 = vpop.permute.xlu1 %600 }
 0x167   : > { %v617_v25 = vmax.f32 %v611_v8, %v616_v18  ;;  %v607_v26 = vmin.f32 %v601_v9, %v606_v19  ;;  %v653_v38 = vmin.f32 %v611_v8, %v616_v18  ;;  %v652_v40 = vmax.f32 %v601_v9, %v606_v19 }
 0x168   : > { %v715_v9 = vrot.slane %v597_v37, %v714_v50 }
 0x169   : > { %v618_v39 = vsub.f32 %v607_v26, %v617_v25  ;;  %v654_v58 = vsub.f32 %v652_v40, %v653_v38 }
 0x16b   : > { %v622_v15 = vpop.permute.xlu0 %621  ;;  %v631_v17 = vpop.permute.xlu1 %630  ;;  %v619_v57 = vmax.f32 %v618_v39, 0.0 }
 0x16c   : > { %v628_v22 = vmin.f32 %v622_v15, %v627_v14  ;;  %v637_v23 = vmax.f32 %v631_v17, %v636_v16  ;;  %v655_v34 = vmax.f32 %v622_v15, %v627_v14  ;;  %v656_v36 = vmin.f32 %v631_v17, %v636_v16 }
 0x16e   : > { %v638_v35 = vsub.f32 %v628_v22, %v637_v23  ;;  %v657_v53 = vsub.f32 %v655_v34, %v656_v36  ;;  %v1106_v22 = vpop.eup %1105 }
 0x16f   : > { %v570_v23 = vmul.f32 %v1106_v22, %v568_v10 }
 0x170   : > { %v669_v27 = vpop.permute.xlu0 %668  ;;  %v678_v28 = vpop.permute.xlu1 %677  ;;  %v639_v52 = vmax.f32 %v638_v35, 0.0  ;;  %v658_v2 = vmul.f32 %v657_v53, %v654_v58 }
 0x171   : > { %v675_v41 = vmin.f32 %v669_v27, %v674_v29  ;;  %v718_v42 = vmax.f32 %v669_v27, %v674_v29  ;;  %v684_v43 = vmax.f32 %v678_v28, %v683_v30  ;;  %v719_v44 = vmin.f32 %v678_v28, %v683_v30 }
 0x172   : > { %v498_v59 = vpop.f32.mrf.mxu0  ;;  %v640_v3 = vmul.f32 %v639_v52, %v619_v57  ;;  %v662_v13 = vmax.f32 %v658_v2, 1e-07  ;;  %v574_v29 = vand.u32 2147483648, %v568_v10  ;;  %v572_v30 = vsel %vm571_vm3, %v568_v10, %v570_v23 }
 0x173   : > { %v685_v60 = vsub.f32 %v675_v41, %v684_v43  ;;  %v720_v62 = vsub.f32 %v718_v42, %v719_v44 }
 0x174   : > { %v979_v5 = vpop.f32.mrf.mxu0  ;;  %v575_v34 = vsel %vm573_vm4, %v574_v29, %v572_v30 }
 0x175   : > { %v698_v45 = vpop.permute.xlu0 %697  ;;  %v689_v46 = vpop.permute.xlu1 %688  ;;  %v686_v7 = vmax.f32 %v685_v60, 0.0  ;;  %v733_v35 = vadd.f32 %v575_v34, %v498_v59 }
 0x176   : > { %v704_v47 = vmax.f32 %v698_v45, %v703_v31  ;;  %v722_v48 = vmin.f32 %v698_v45, %v703_v31  ;;  %v695_v49 = vmin.f32 %v689_v46, %v694_v32  ;;  %v721_v51 = vmax.f32 %v689_v46, %v694_v32  ;;  %v501_v12 = vpop.f32.mrf.mxu0 }
 0x178   : > { %v705_v55 = vsub.f32 %v695_v49, %v704_v47  ;;  %v723_v56 = vsub.f32 %v721_v51, %v722_v48  ;;  %v980_v16 = vpop.f32.mrf.mxu0 }
 0x17a   : > { %v644_v0 = vpop.permute.xlu1 %643  ;;  %v706_v6 = vmax.f32 %v705_v55, 0.0  ;;  %v724_v8 = vmul.f32 %v723_v56, %v720_v62 }
 0x17b   : > { %v650_v4 = vadd.f32 %v649_v54, %v644_v0 }
 0x17c   : > { %v728_v17 = vmax.f32 %v724_v8, 1e-07  ;;  %v707_v18 = vmul.f32 %v706_v6, %v686_v7 }
 0x17d   : > { %v651_v11 = vsub.f32 %v650_v4, %v640_v3 }
 0x17f   : > { %v659_v14 = vmax.f32 %v651_v11, 1e-07  ;;  %v710_v15 = vpop.permute.xlu1 %709 }
 0x180   : > { %v716_v19 = vadd.f32 %v715_v9, %v710_v15 }
 0x181   : > { %1107 = vrcp.f32 %v659_v14 }
 0x182   : > { %v717_v20 = vsub.f32 %v716_v19, %v707_v18  ;;  %1109 = vrcp.f32 %v662_v13 }
 0x183   : > { %1111 = vrcp.f32 %v728_v17 }
 0x184   : > { %v725_v21 = vmax.f32 %v717_v20, 1e-07 }
 0x186   : > { %1113 = vrcp.f32 %v725_v21 }
 0x18e   : > { %v1108_v61 = vpop.eup %1107 }
 0x18f   : > { %v1110_v63 = vpop.eup %1109  ;;  %v661_v24 = vmul.f32 %v1108_v61, %v640_v3 }
 0x190   : > { %v1112_v1 = vpop.eup %1111  ;;  %v664_v26 = vmul.f32 %v1110_v63, %v651_v11 }
 0x191   : > { %v730_v28 = vmul.f32 %v1112_v1, %v717_v20 }
 0x192   : > { %v665_v31 = vadd.f32 %v664_v26, %v661_v24 }
 0x193   : > { %v1114_v25 = vpop.eup %1113 }
 0x194   : > { %v727_v27 = vmul.f32 %v1114_v25, %v707_v18 }
 0x196   : > { %v731_v32 = vadd.f32 %v730_v28, %v727_v27 }
 0x198   : > { %v732_v33 = vadd.f32 %v731_v32, %v665_v31 }
 0x19a   : > { %v734_v36 = vsub.f32 2.0, %v732_v33 }
 0x19c   : > { %v735_v37 = vadd.f32 %v734_v36, %v733_v35 }
 0x19e   : > { %736 = vst [vmem:[%s1555_s18] sm:$0xff] %v735_v37 }
 0x19f PF: > { %p944_p8 = scmp.gt.s32.totalorder %s1553_s19, 0 }
 0x1a1   : > { %740 = sbr.rel (%p944_p8) target bundleno = 424 (0x1a8), region = 60 }
 0x1a6   : > { %v1344_v38 = vmov 0.0  }
 0x1a7   : > { %741 = vst [vmem:[%s1555_s18] sm:$0xff] %v1344_v38 }
 0x1a8 PF: > { %s946_s9 = sshll.u32 %s1317_s24, 7  ;;  %s758_s27 = sshll.u32 %s1555_s18, 4  ;;  %s759_s27 = int_to_ptr.vmem [resolvable:$true] %s758_s27 }
 0x1a9   : > { %s756_s6 = scalar_lea.hbm %s1647_s5, %s946_s9  ;;  %s743_s28 = scalar_lea.sflag [#allocation6], %s1525_s11 }
 0x1aa   : > { %s1235_s16 = scalar_lea.vmem %s759_s27, 128  ;;  %s1345_s14 = smov [#allocation12]  }
 0x1ab   : > { %p1236_p1 = scmp.ne.s32.totalorder %s759_s27, %s1235_s16  ;;  %s1239_s15 = sshll.u32 %s1345_s14, 4  ;;  %s1240_s15 = int_to_ptr.vmem [resolvable:$false] %s1239_s15 }
 0x1ac   : > { %s1241_s13 = scalar_lea.vmem %s1240_s15, 256  ;;  %p1242_p12 = scmp.lt.s32.totalorder %s759_s27, %s1240_s15 }
 0x1ad   : > { %p1237_p3 = pnand %p1236_p1, %p1434_p9  ;;  %p1243_p2 = scmp.lt.s32.totalorder %s1241_s13, %s1235_s16 }
 0x1af   : > { %p1238_p13 = pneg %p1237_p3  ;;  %p1244_p4 = por %p1243_p2, %p1242_p12 }
 0x1b1   : > { %p1245_p5 = pnand %p1244_p4, %p1238_p13 }
 0x1b3   : > { %1248 = shalt.err (!%p1245_p5)
}
 0x1b4   : > { %s1249_s24 = scalar_lea.hbm %s756_s6, 128  ;;  %s1253_s20 = scalar_lea.hbm %s1647_s5, 256 }
 0x1b5   : > { %p1250_p6 = scmp.ne.s32.totalorder %s756_s6, %s1249_s24  ;;  %p1254_p0 = scmp.lt.s32.totalorder %s756_s6, %s1647_s5 }
 0x1b6   : > { %p1255_p8 = scmp.lt.s32.totalorder %s1253_s20, %s1249_s24 }
 0x1b7   : > { %p1251_p7 = pnand %p1250_p6, %p1434_p9 }
 0x1b8   : > { %p1256_p1 = por %p1255_p8, %p1254_p0 }
 0x1b9   : > { %p1252_p10 = pneg %p1251_p7 }
 0x1bb   : > { %p1257_p3 = pnand %p1256_p1, %p1252_p10 }
 0x1bd   : > { %1260 = shalt.err (!%p1257_p3)
}
 0x1be   : > { %995 = dma.vmem_to_hbm [thread:$0]  (%p1434_p9), %s759_s27, 128, %s756_s6, %s743_s28  }
 0x1bf PF: > { %s770_s26 = sand.u32 1, %s1305_s21   ;;  %p1661_p13 = scmp.ge.s32.totalorder %s1325_s25, 2 }
 0x1c0   : > { %s771_s19 = scalar_lea.sflag [#allocation6], %s770_s26 }
 0x1c1   : > { %p1011_p12 = pnand %p1661_p13, %p1441_p11 }
 0x1c3   : > { %p1012_p2 = pneg %p1011_p12 }
 0x1c5   : > { %1300 = dma.done.wait (%p1012_p2), %s771_s19, 128  }
 0x1c6   : > { %1302 = vsyncadd (%p1012_p2), %s771_s19, 4294967168  ;;  %s31_s25 = sadd.s32 1, %s1325_s25   ;;  %s1662_s18 = sld [smem:[#allocation20_spill]] }
 0x1c7   : > { %p28_p4 = scmp.ge.s32.totalorder %s31_s25, 4   ;;  %s1663_s24 = sld [smem:[#allocation18_spill]] }
 0x1c8   : > { %s1664_s0 = sld [smem:[#allocation19_spill]]  ;;  %s1665_s21 = smov %s1309_s22 }
 0x1c9   : > { %s1666_s22 = smov %s1313_s23  ;;  %30 = sbr.rel (!%p28_p4) target bundleno = 16 (0x10), region = 126 }
 0x1cc   : > { %s1667_s23 = smov %s1662_s18 }
 0x1ce   :  { %776 = vsyncpa [#allocation5], 1 }
 0x1cf   :  { %778 = vsyncpa [#allocation5 + $0x1], 1 }
 0x1d0   :  { %779 = vsyncpa [#allocation8], 1 }
 0x1d1   :  { %781 = vsyncpa [#allocation8 + $0x1], 1 }
 0x1d2   :  { %782 = vsyncpa [#allocation11], 1 }
 0x1d3   :  { %784 = vsyncpa [#allocation11 + $0x1], 1 }
 0x1d4   :  { %785 = vsyncpa [#allocation6], 1 }
 0x1d5   :  { %787 = vsyncpa [#allocation6 + $0x1], 1 }

</bundles_post_ra>
